<compile_context>
chip_gen: v7x
topology: tpu7x:2x2x1
jax: 0.10.0
libtpu: 0.0.40
codegen_flags: <defaults>
</compile_context>

<pallas_src>
import functools

import jax
import jax.numpy as jnp
from jax.experimental import pallas as pl


def _round_up(v, m):
    return (v + m - 1) // m * m


# ---------------------------------------------------------------------------
# Fused kernel: one loop of (dot -> +bias -> activation) over packed layers.
# ---------------------------------------------------------------------------
def _fused_generator_kernel(x_ref, w_ref, b_ref, o_ref, *, acts, matmul_dtype):
    x = x_ref[...]
    for li, act in enumerate(acts):          # static Python loop, traced once
        w = w_ref[li]                        # static leading-axis index
        if matmul_dtype is not None:         # bf16 MXU feed at scale (v6e/v7x)
            xd, wd = x.astype(matmul_dtype), w.astype(matmul_dtype)
        else:
            xd, wd = x, w
        v = jnp.dot(xd, wd, preferred_element_type=jnp.float32) + b_ref[li]
        if act == "tanh":
            x = jnp.tanh(v)                                  # EUP
        else:  # LeakyReLU(0.01): mul+max on the VPU
            x = jnp.maximum(v, 0.01 * v)
    o_ref[...] = x.astype(o_ref.dtype)


# ---------------------------------------------------------------------------
# Parameter packing (block-diagonal branch fusion + zero padding to D_pad).
# In production this packing runs once at load time, not per forward call.
# ---------------------------------------------------------------------------
def pack_generator_params(z_params, y_params, j_params, d_pad, dtype=jnp.float32):
    assert len(z_params) == len(y_params), \
        "block-diagonal z/y fusion requires equal branch depth"
    layers, acts = [], []

    # Branch layers: [[Wz, 0], [0, Wy]], bias [bz | by].  LeakyReLU.
    for (wz, bz), (wy, by) in zip(z_params, y_params):
        zi, zo = wz.shape
        yi, yo = wy.shape
        w = jnp.zeros((d_pad, d_pad), dtype)
        w = w.at[:zi, :zo].set(wz)
        w = w.at[zi:zi + yi, zo:zo + yo].set(wy)
        b = jnp.zeros((1, d_pad), dtype)
        b = b.at[0, :zo].set(bz).at[0, zo:zo + yo].set(by)
        layers.append((w, b))
        acts.append("leaky")

    # Joint layers consume the already-stacked [z_out | y_out] directly
    # (== torch.cat((z, y), dim=1)); last layer uses tanh.
    for i, (w, b) in enumerate(j_params):
        wi, wo = w.shape
        wp = jnp.zeros((d_pad, d_pad), dtype).at[:wi, :wo].set(w)
        bp = jnp.zeros((1, d_pad), dtype).at[0, :wo].set(b)
        layers.append((wp, bp))
        acts.append("tanh" if i == len(j_params) - 1 else "leaky")

    w_slab = jnp.stack([w for (w, _) in layers])   # (L, D_pad, D_pad)
    b_slab = jnp.stack([b for (_, b) in layers])   # (L, 1, D_pad)
    return w_slab, b_slab, tuple(acts)


# ---------------------------------------------------------------------------
# Wrapper: single gridless pallas_call for the whole generator.
# ---------------------------------------------------------------------------
def fc_generator_forward(z, y, z_params, y_params, j_params, channels, img_size,
                         matmul_dtype=None):
    B = z.shape[0]
    out_dim = j_params[-1][0].shape[1]
    assert out_dim == channels * img_size * img_size
    assert j_params[0][0].shape[0] == z_params[-1][0].shape[1] + y_params[-1][0].shape[1]

    # Padded working width: max layer dim rounded up to the 128-lane vreg.
    dims = [z.shape[1] + y.shape[1]]
    for (wz, _), (wy, _) in zip(z_params, y_params):
        dims.append(wz.shape[1] + wy.shape[1])
    for (w, _) in j_params:
        dims.extend([w.shape[0], w.shape[1]])
    d_pad = _round_up(max(dims), 128)
    b_pad = max(8, _round_up(B, 8))          # sublane-aligned M for the MXU

    w_slab, b_slab, acts = pack_generator_params(
        z_params, y_params, j_params, d_pad, jnp.float32)

    # Stacked, zero-padded input [z | y] -> (B_pad, D_pad).
    x = jnp.zeros((b_pad, d_pad), z.dtype)
    x = x.at[:B, :z.shape[1]].set(z)
    x = x.at[:B, z.shape[1]:z.shape[1] + y.shape[1]].set(y)

    kernel = functools.partial(
        _fused_generator_kernel, acts=acts, matmul_dtype=matmul_dtype)

    # Gridless call: 3 full-array VMEM blocks in, one lane-dense (x8,x128)
    # block out.  Total parameter footprint is a few hundred KiB -> fits the
    # scoped VMEM limit on every TPU generation; one launch per forward pass.
    out_padded = pl.pallas_call(
        kernel,
        out_shape=jax.ShapeDtypeStruct((b_pad, d_pad), z.dtype),
        in_specs=[
            pl.BlockSpec(x.shape, lambda: (0, 0)),
            pl.BlockSpec(w_slab.shape, lambda: (0, 0, 0)),
            pl.BlockSpec(b_slab.shape, lambda: (0, 0, 0)),
        ],
        out_specs=pl.BlockSpec((b_pad, d_pad), lambda: (0, 0)),
    )(x, w_slab, b_slab)

    # Un-pad and reshape, matching `j_emb.view(-1, channels, img_size, img_size)`.
    return out_padded[:B, :out_dim].reshape(-1, channels, img_size, img_size)


# ---------------------------------------------------------------------------
# Parameter init (PyTorch nn.Linear-style uniform(-k, k))
# ---------------------------------------------------------------------------
def init_linear(key, in_dim, out_dim, dtype=jnp.float32):
    kw, kb = jax.random.split(key)
    bound = 1.0 / jnp.sqrt(jnp.asarray(in_dim, jnp.float32))
    w = jax.random.uniform(kw, (in_dim, out_dim), dtype, -bound, bound)
    b = jax.random.uniform(kb, (out_dim,), dtype, -bound, bound)
    return w, b


def init_stack(key, dims):
    params = []
    for i in range(len(dims) - 1):
        key, sub = jax.random.split(key)
        params.append(init_linear(sub, dims[i], dims[i + 1]))
    return params


# ---------------------------------------------------------------------------
# Pure-JAX reference (for correctness check)
# ---------------------------------------------------------------------------
def _reference_forward(z, y, z_params, y_params, j_params, channels, img_size):
    def block(x, w, b, act):
        v = jnp.dot(x, w, precision=jax.lax.Precision.HIGHEST) + b
        return jnp.tanh(v) if act == "tanh" else jnp.where(v >= 0, v, 0.01 * v)
    for (w, b) in z_params:
        z = block(z, w, b, "leaky")
    for (w, b) in y_params:
        y = block(y, w, b, "leaky")
    j = jnp.concatenate((z, y), axis=1)
    for i, (w, b) in enumerate(j_params):
        j = block(j, w, b, "tanh" if i == len(j_params) - 1 else "leaky")
    return j.reshape(-1, channels, img_size, img_size)


if __name__ == "__main__":
    # Small synthetic config consistent with the module:
    #   img_channels=1, img_size=4  -> final joint dim must be 1*4*4 = 16
    img_channels, img_size = 1, 4
    gen_z_fcs = [8, 32, 64]
    gen_y_fcs = [8, 32, 64]
    gen_j_fcs = [gen_z_fcs[-1] + gen_y_fcs[-1], 64,
                 img_channels * img_size * img_size]
    batch = 2

    key = jax.random.PRNGKey(0)
    kz, ky, kpz, kpy, kpj = jax.random.split(key, 5)

    z = jax.random.normal(kz, (batch, gen_z_fcs[0]), jnp.float32)
    y = jax.random.normal(ky, (batch, gen_y_fcs[0]), jnp.float32)

    z_params = init_stack(kpz, gen_z_fcs)
    y_params = init_stack(kpy, gen_y_fcs)
    j_params = init_stack(kpj, gen_j_fcs)

    out = fc_generator_forward(z, y, z_params, y_params, j_params,
                               img_channels, img_size)
    out = jax.block_until_ready(out)
    assert out.shape == (batch, img_channels, img_size, img_size), out.shape

    ref = _reference_forward(z, y, z_params, y_params, j_params,
                             img_channels, img_size)
    assert jnp.allclose(out, ref, rtol=5e-3, atol=5e-3), \
        float(jnp.max(jnp.abs(out - ref)))
    print("KERNEL_OK")
</pallas_src>

<mosaic_0001>
module attributes {stable_mosaic.version = 11 : i64} {
  func.func @_fused_generator_kernel(%arg0: memref<8x128xf32, #tpu.memory_space<vmem>>, %arg1: memref<4x128x128xf32, #tpu.memory_space<vmem>>, %arg2: memref<4x1x128xf32, #tpu.memory_space<vmem>>, %arg3: memref<8x128xf32, #tpu.memory_space<vmem>>) attributes {dimension_semantics = [], scalar_prefetch = 0 : i64, scratch_operands = 0 : i64, tpu.core_type = #tpu.core_type<tc>} {
    %c0 = arith.constant 0 : index
    %c0_0 = arith.constant 0 : index
    %0 = vector.load %arg0[%c0, %c0_0] : memref<8x128xf32, #tpu.memory_space<vmem>>, vector<8x128xf32>
    %c0_1 = arith.constant 0 : index
    %c0_2 = arith.constant 0 : index
    %c0_3 = arith.constant 0 : index
    %1 = vector.load %arg1[%c0_1, %c0_2, %c0_3] : memref<4x128x128xf32, #tpu.memory_space<vmem>>, vector<1x128x128xf32>
    %2 = vector.shape_cast %1 : vector<1x128x128xf32> to vector<128x128xf32>
    %cst = arith.constant dense<0.000000e+00> : vector<8x128xf32>
    %3 = tpu.matmul %0, %2, %cst {dimension_numbers = #tpu.dot_dimension_numbers<[1], [0], [0], [1], [0, 0, 1, 1], [], []>} : vector<8x128xf32>, vector<128x128xf32>, vector<8x128xf32> -> vector<8x128xf32>
    %c0_4 = arith.constant 0 : index
    %c0_5 = arith.constant 0 : index
    %c0_6 = arith.constant 0 : index
    %4 = vector.load %arg2[%c0_4, %c0_5, %c0_6] : memref<4x1x128xf32, #tpu.memory_space<vmem>>, vector<1x1x128xf32>
    %5 = vector.shape_cast %4 : vector<1x1x128xf32> to vector<1x128xf32>
    %6 = vector.broadcast %5 : vector<1x128xf32> to vector<8x128xf32>
    %7 = arith.addf %3, %6 : vector<8x128xf32>
    %cst_7 = arith.constant 0.00999999977 : f32
    %8 = vector.broadcast %cst_7 : f32 to vector<8x128xf32>
    %9 = arith.mulf %8, %7 : vector<8x128xf32>
    %10 = arith.maximumf %7, %9 : vector<8x128xf32>
    %c1 = arith.constant 1 : index
    %c0_8 = arith.constant 0 : index
    %c0_9 = arith.constant 0 : index
    %11 = vector.load %arg1[%c1, %c0_8, %c0_9] : memref<4x128x128xf32, #tpu.memory_space<vmem>>, vector<1x128x128xf32>
    %12 = vector.shape_cast %11 : vector<1x128x128xf32> to vector<128x128xf32>
    %cst_10 = arith.constant dense<0.000000e+00> : vector<8x128xf32>
    %13 = tpu.matmul %10, %12, %cst_10 {dimension_numbers = #tpu.dot_dimension_numbers<[1], [0], [0], [1], [0, 0, 1, 1], [], []>} : vector<8x128xf32>, vector<128x128xf32>, vector<8x128xf32> -> vector<8x128xf32>
    %c1_11 = arith.constant 1 : index
    %c0_12 = arith.constant 0 : index
    %c0_13 = arith.constant 0 : index
    %14 = vector.load %arg2[%c1_11, %c0_12, %c0_13] : memref<4x1x128xf32, #tpu.memory_space<vmem>>, vector<1x1x128xf32>
    %15 = vector.shape_cast %14 : vector<1x1x128xf32> to vector<1x128xf32>
    %16 = vector.broadcast %15 : vector<1x128xf32> to vector<8x128xf32>
    %17 = arith.addf %13, %16 : vector<8x128xf32>
    %cst_14 = arith.constant 0.00999999977 : f32
    %18 = vector.broadcast %cst_14 : f32 to vector<8x128xf32>
    %19 = arith.mulf %18, %17 : vector<8x128xf32>
    %20 = arith.maximumf %17, %19 : vector<8x128xf32>
    %c2 = arith.constant 2 : index
    %c0_15 = arith.constant 0 : index
    %c0_16 = arith.constant 0 : index
    %21 = vector.load %arg1[%c2, %c0_15, %c0_16] : memref<4x128x128xf32, #tpu.memory_space<vmem>>, vector<1x128x128xf32>
    %22 = vector.shape_cast %21 : vector<1x128x128xf32> to vector<128x128xf32>
    %cst_17 = arith.constant dense<0.000000e+00> : vector<8x128xf32>
    %23 = tpu.matmul %20, %22, %cst_17 {dimension_numbers = #tpu.dot_dimension_numbers<[1], [0], [0], [1], [0, 0, 1, 1], [], []>} : vector<8x128xf32>, vector<128x128xf32>, vector<8x128xf32> -> vector<8x128xf32>
    %c2_18 = arith.constant 2 : index
    %c0_19 = arith.constant 0 : index
    %c0_20 = arith.constant 0 : index
    %24 = vector.load %arg2[%c2_18, %c0_19, %c0_20] : memref<4x1x128xf32, #tpu.memory_space<vmem>>, vector<1x1x128xf32>
    %25 = vector.shape_cast %24 : vector<1x1x128xf32> to vector<1x128xf32>
    %26 = vector.broadcast %25 : vector<1x128xf32> to vector<8x128xf32>
    %27 = arith.addf %23, %26 : vector<8x128xf32>
    %cst_21 = arith.constant 0.00999999977 : f32
    %28 = vector.broadcast %cst_21 : f32 to vector<8x128xf32>
    %29 = arith.mulf %28, %27 : vector<8x128xf32>
    %30 = arith.maximumf %27, %29 : vector<8x128xf32>
    %c3 = arith.constant 3 : index
    %c0_22 = arith.constant 0 : index
    %c0_23 = arith.constant 0 : index
    %31 = vector.load %arg1[%c3, %c0_22, %c0_23] : memref<4x128x128xf32, #tpu.memory_space<vmem>>, vector<1x128x128xf32>
    %32 = vector.shape_cast %31 : vector<1x128x128xf32> to vector<128x128xf32>
    %cst_24 = arith.constant dense<0.000000e+00> : vector<8x128xf32>
    %33 = tpu.matmul %30, %32, %cst_24 {dimension_numbers = #tpu.dot_dimension_numbers<[1], [0], [0], [1], [0, 0, 1, 1], [], []>} : vector<8x128xf32>, vector<128x128xf32>, vector<8x128xf32> -> vector<8x128xf32>
    %c3_25 = arith.constant 3 : index
    %c0_26 = arith.constant 0 : index
    %c0_27 = arith.constant 0 : index
    %34 = vector.load %arg2[%c3_25, %c0_26, %c0_27] : memref<4x1x128xf32, #tpu.memory_space<vmem>>, vector<1x1x128xf32>
    %35 = vector.shape_cast %34 : vector<1x1x128xf32> to vector<1x128xf32>
    %36 = vector.broadcast %35 : vector<1x128xf32> to vector<8x128xf32>
    %37 = arith.addf %33, %36 : vector<8x128xf32>
    %38 = math.tanh %37 : vector<8x128xf32>
    %c0_28 = arith.constant 0 : index
    %c0_29 = arith.constant 0 : index
    %39 = vector.load %arg3[%c0_28, %c0_29] : memref<8x128xf32, #tpu.memory_space<vmem>>, vector<8x128xf32>
    tpu.vector_store %arg3[%c0_28, %c0_29], %38 {strides = array<i32>} : memref<8x128xf32, #tpu.memory_space<vmem>>, vector<8x128xf32>,
    return
  }
}

</mosaic_0001>

<bundles_post_ra>
// kernel: tpu_custom_call.1
= control target key start
LH: loop header
LB: loop body
LE: loop exit
PB: predicated region body
PF: predicated region fallthrough
CT: control target
= control target key end

     0   :  { %8 = vsyncpa [#allocation3], 0  ;;  %s960_s0 = inlined_call_operand.hbm [shape: f32[8,128], index: 0, kind: input, shape index: {}]   ;;  %s961_s1 = inlined_call_operand.hbm [shape: f32[4,128,128], index: 1, kind: input, shape index: {}]   ;;  %s962_s2 = inlined_call_operand.vmem [shape: f32[4,1,128], index: 2, kind: input, shape index: {}]   ;;  %s963_s3 = inlined_call_operand.hbm [shape: f32[8,128], index: 3, kind: output, shape index: {}]  }
   0x1   :  { %9 = vsyncpa [#allocation6], 0 }
   0x2   :  { %10 = vsyncpa [#allocation4], 0  ;;  %s837_s12 = smov [#allocation2]   ;;  %s838_s14 = smov [#allocation5]  }
   0x3   :  { %s17_s13 = sshll.u32 %s837_s12, 4  ;;  %s26_s15 = sshll.u32 %s838_s14, 4  ;;  %s18_s13 = int_to_ptr.vmem [resolvable:$true] %s17_s13  ;;  %s865_s15 = int_to_ptr.vmem [resolvable:$true] %s26_s15 }
   0x4   :  { %s765_s18 = scalar_lea.hbm %s960_s0, 128 }
   0x5   :  { %p766_p0 = scmp.ne.s32.totalorder %s960_s0, %s765_s18  ;;  %p769_p1 = scmp.lt.u32.totalorder %s765_s18, %s960_s0 }
   0x7   :  { %p771_p2 = pnand %p769_p1, %p766_p0 }
   0x9   :  { %774 = shalt.err (!%p771_p2)
}
   0xa   :  { %s775_s23 = scalar_lea.vmem %s18_s13, 128  ;;  %p780_p4 = scmp.lt.s32.totalorder %s18_s13, %s18_s13 }
   0xb   :  { %p776_p3 = scmp.ne.s32.totalorder %s18_s13, %s775_s23  ;;  %p781_p5 = scmp.lt.s32.totalorder %s775_s23, %s775_s23 }
   0xd   :  { %p782_p6 = por %p781_p5, %p780_p4 }
   0xf   :  { %p783_p7 = pnand %p782_p6, %p776_p3 }
  0x11   :  { %786 = shalt.err (!%p783_p7)
}
  0x12   :  { %20 = dma.hbm_to_vmem [thread:$0]  %s960_s0, 128, %s18_s13, [#allocation3]  }
  0x13   :  { %s787_s28 = scalar_lea.hbm %s961_s1, 8192 }
  0x14   :  { %p788_p8 = scmp.ne.s32.totalorder %s961_s1, %s787_s28  ;;  %p791_p9 = scmp.lt.u32.totalorder %s787_s28, %s961_s1 }
  0x16   :  { %p793_p10 = pnand %p791_p9, %p788_p8 }
  0x18   :  { %796 = shalt.err (!%p793_p10)
}
  0x19   :  { %s797_s6 = scalar_lea.vmem %s865_s15, 8192  ;;  %p802_p12 = scmp.lt.s32.totalorder %s865_s15, %s865_s15 }
  0x1a   :  { %p798_p11 = scmp.ne.s32.totalorder %s865_s15, %s797_s6  ;;  %p803_p13 = scmp.lt.s32.totalorder %s797_s6, %s797_s6 }
  0x1c   :  { %p804_p0 = por %p803_p13, %p802_p12 }
  0x1e   :  { %p805_p1 = pnand %p804_p0, %p798_p11 }
  0x20   :  { %808 = shalt.err (!%p805_p1)
}
  0x21   :  { %s839_s0 = smov 128   ;;  %s840_s7 = smov 8  }
  0x22   :  { %32 = dma.hbm_to_vmem [thread:$0]  %s961_s1, 8192, %s865_s15, [#allocation6], %s839_s0, %s839_s0, %s840_s7  }
  0x23   :  { %831 = dma.done.wait [#allocation3], 128  }
  0x24   :  { %832 = vsyncadd [#allocation3], 4294967168 }
  0x25   :  { %833 = dma.done.wait [#allocation6], 8192  }
  0x26   :  { %834 = vsyncadd [#allocation6], 4294959104  ;;  %v841_v0 = vmov 0.0|0.0   ;;  %vm842_vm0 = vmmov 0   ;;  %v843_v1 = vmov 0.0   ;;  %v42_v2 = vld [vmem:[#allocation5] sm:$0xff] }
  0x27   :  { %659 = vmatprep.subr.bf16.mxu0 %v841_v0  ;;  %551 = vmatprep.mubr.msk.f32.mxu0 %vm842_vm0, %v843_v1  ;;  %v43_v3 = vld [vmem:[#allocation5 + $0x8] sm:$0xff]  ;;  %v44_v4 = vld [vmem:[#allocation5 + $0x10] sm:$0xff]  ;;  %v45_v6 = vld [vmem:[#allocation5 + $0x18] sm:$0xff]  ;;  %s844_s17 = smov [#allocation7]  }
  0x28   :  { %683 = vmatprep.subr.bf16.mxu1 %v841_v0  ;;  %586 = vmatprep.mubr.msk.f32.mxu1 %vm842_vm0, %v843_v1  ;;  %v660_v5 = vpack.c.bf16 %v43_v3, %v42_v2  ;;  %v663_v7 = vpack.c.bf16 %v45_v6, %v44_v4  ;;  %v46_v8 = vld [vmem:[#allocation5 + $0x20] sm:$0xff]  ;;  %v47_v9 = vld [vmem:[#allocation5 + $0x28] sm:$0xff]  ;;  %v140_v12 = vld [vmem:[#allocation5 + $0x90] sm:$0xff]  ;;  %s434_s18 = sshll.u32 %s844_s17, 4  ;;  %s435_s18 = int_to_ptr.vmem [resolvable:$true] %s434_s18 }
  0x29   :  { %v138_v10 = vld [vmem:[#allocation5 + $0x80] sm:$0xff]  ;;  %v139_v11 = vld [vmem:[#allocation5 + $0x88] sm:$0xff]  ;;  %v141_v13 = vld [vmem:[#allocation5 + $0x98] sm:$0xff]  ;;  %v666_v14 = vpack.c.bf16 %v47_v9, %v46_v8  ;;  %s809_s19 = scalar_lea.vmem %s435_s18, 128  ;;  %p814_p3 = scmp.lt.s32.totalorder %s435_s18, %s435_s18 }
  0x2a   :  { %661 = vmatpush3.bf16.msra.mxu0 %v660_v5  ;;  %v684_v15 = vpack.c.bf16 %v139_v11, %v138_v10  ;;  %v48_v16 = vld [vmem:[#allocation5 + $0x30] sm:$0xff]  ;;  %v49_v17 = vld [vmem:[#allocation5 + $0x38] sm:$0xff]  ;;  %v687_v18 = vpack.c.bf16 %v141_v13, %v140_v12  ;;  %v142_v19 = vld [vmem:[#allocation5 + $0xa0] sm:$0xff]  ;;  %p810_p2 = scmp.ne.s32.totalorder %s435_s18, %s809_s19  ;;  %p815_p4 = scmp.lt.s32.totalorder %s809_s19, %s809_s19 }
  0x2b   :  { %662 = vmatprep.subr.bf16.mxu0 %v841_v0  ;;  %v143_v20 = vld [vmem:[#allocation5 + $0xa8] sm:$0xff]  ;;  %v669_v21 = vpack.c.bf16 %v49_v17, %v48_v16  ;;  %v50_v22 = vld [vmem:[#allocation5 + $0x40] sm:$0xff]  ;;  %v144_v25 = vld [vmem:[#allocation5 + $0xb0] sm:$0xff] }
  0x2c   :  { %685 = vmatpush3.bf16.msra.mxu1 %v684_v15  ;;  %v51_v23 = vld [vmem:[#allocation5 + $0x48] sm:$0xff]  ;;  %v690_v24 = vpack.c.bf16 %v143_v20, %v142_v19  ;;  %v145_v26 = vld [vmem:[#allocation5 + $0xb8] sm:$0xff]  ;;  %v52_v28 = vld [vmem:[#allocation5 + $0x50] sm:$0xff]  ;;  %p816_p5 = por %p815_p4, %p814_p3 }
  0x2d   :  { %686 = vmatprep.subr.bf16.mxu1 %v841_v0  ;;  %v672_v27 = vpack.c.bf16 %v51_v23, %v50_v22  ;;  %v53_v29 = vld [vmem:[#allocation5 + $0x58] sm:$0xff]  ;;  %v693_v30 = vpack.c.bf16 %v145_v26, %v144_v25  ;;  %v146_v31 = vld [vmem:[#allocation5 + $0xc0] sm:$0xff]  ;;  %v147_v32 = vld [vmem:[#allocation5 + $0xc8] sm:$0xff] }
  0x2e   :  { %664 = vmatpush3.bf16.msra.mxu0 %v663_v7  ;;  %v675_v33 = vpack.c.bf16 %v53_v29, %v52_v28  ;;  %v54_v34 = vld [vmem:[#allocation5 + $0x60] sm:$0xff]  ;;  %v55_v35 = vld [vmem:[#allocation5 + $0x68] sm:$0xff]  ;;  %v696_v36 = vpack.c.bf16 %v147_v32, %v146_v31  ;;  %v148_v37 = vld [vmem:[#allocation5 + $0xd0] sm:$0xff]  ;;  %p817_p6 = pnand %p816_p5, %p810_p2 }
  0x2f   :  { %665 = vmatprep.subr.bf16.mxu0 %v841_v0  ;;  %v149_v38 = vld [vmem:[#allocation5 + $0xd8] sm:$0xff]  ;;  %v678_v39 = vpack.c.bf16 %v55_v35, %v54_v34  ;;  %v56_v40 = vld [vmem:[#allocation5 + $0x70] sm:$0xff]  ;;  %v150_v45 = vld [vmem:[#allocation5 + $0xe0] sm:$0xff] }
  0x30   :  { %688 = vmatpush3.bf16.msra.mxu1 %v687_v18  ;;  %v57_v41 = vld [vmem:[#allocation5 + $0x78] sm:$0xff]  ;;  %v699_v42 = vpack.c.bf16 %v149_v38, %v148_v37  ;;  %v151_v46 = vld [vmem:[#allocation5 + $0xe8] sm:$0xff]  ;;  %v152_v48 = vld [vmem:[#allocation5 + $0xf0] sm:$0xff] }
  0x31   :  { %689 = vmatprep.subr.bf16.mxu1 %v841_v0  ;;  %v681_v43 = vpack.c.bf16 %v57_v41, %v56_v40  ;;  %v41_v44 = vld [vmem:[#allocation2] sm:$0xff]  ;;  %v702_v47 = vpack.c.bf16 %v151_v46, %v150_v45  ;;  %v235_v51 = vld [vmem:[#allocation5 + $0x100] sm:$0xff]  ;;  %v236_v52 = vld [vmem:[#allocation5 + $0x108] sm:$0xff] }
  0x32   :  { %667 = vmatpush3.bf16.msra.mxu0 %v666_v14  ;;  %v153_v49 = vld [vmem:[#allocation5 + $0xf8] sm:$0xff]  ;;  %v237_v53 = vld [vmem:[#allocation5 + $0x110] sm:$0xff]  ;;  %v708_v54 = vpack.c.bf16 %v236_v52, %v235_v51  ;;  %v239_v57 = vld [vmem:[#allocation5 + $0x120] sm:$0xff] }
  0x33   :  { %668 = vmatprep.subr.bf16.mxu0 %v841_v0  ;;  %v705_v50 = vpack.c.bf16 %v153_v49, %v152_v48  ;;  %v238_v55 = vld [vmem:[#allocation5 + $0x118] sm:$0xff]  ;;  %v240_v58 = vld [vmem:[#allocation5 + $0x128] sm:$0xff]  ;;  %v241_v60 = vld [vmem:[#allocation5 + $0x130] sm:$0xff] }
  0x34   :  { %691 = vmatpush3.bf16.msra.mxu1 %v690_v24  ;;  %v711_v56 = vpack.c.bf16 %v238_v55, %v237_v53  ;;  %v714_v59 = vpack.c.bf16 %v240_v58, %v239_v57  ;;  %v242_v61 = vld [vmem:[#allocation5 + $0x138] sm:$0xff]  ;;  %v243_v63 = vld [vmem:[#allocation5 + $0x140] sm:$0xff]  ;;  %v244_v2 = vld [vmem:[#allocation5 + $0x148] sm:$0xff] }
  0x35   :  { %692 = vmatprep.subr.bf16.mxu1 %v841_v0  ;;  %v717_v62 = vpack.c.bf16 %v242_v61, %v241_v60  ;;  %v720_v3 = vpack.c.bf16 %v244_v2, %v243_v63  ;;  %v245_v4 = vld [vmem:[#allocation5 + $0x150] sm:$0xff]  ;;  %v246_v5 = vld [vmem:[#allocation5 + $0x158] sm:$0xff]  ;;  %v247_v13 = vld [vmem:[#allocation5 + $0x160] sm:$0xff] }
  0x36   :  { %670 = vmatpush3.bf16.msra.mxu0 %v669_v21  ;;  %v723_v6 = vpack.c.bf16 %v246_v5, %v245_v4  ;;  %v444_v7 = vld [vmem:[%s962_s2] ss:$0 sm:$0xff]  ;;  %v248_v14 = vld [vmem:[#allocation5 + $0x168] sm:$0xff]  ;;  %v249_v16 = vld [vmem:[#allocation5 + $0x170] sm:$0xff] }
  0x37   :  { %671 = vmatprep.subr.bf16.mxu0 %v841_v0  ;;  %v726_v15 = vpack.c.bf16 %v248_v14, %v247_v13  ;;  %v250_v17 = vld [vmem:[#allocation5 + $0x178] sm:$0xff]  ;;  %v332_v19 = vld [vmem:[#allocation5 + $0x180] sm:$0xff]  ;;  %v333_v20 = vld [vmem:[#allocation5 + $0x188] sm:$0xff] }
  0x38   :  { %694 = vmatpush3.bf16.msra.mxu1 %v693_v30  ;;  %v729_v18 = vpack.c.bf16 %v250_v17, %v249_v16  ;;  %v334_v21 = vld [vmem:[#allocation5 + $0x190] sm:$0xff]  ;;  %v732_v22 = vpack.c.bf16 %v333_v20, %v332_v19  ;;  %v335_v23 = vld [vmem:[#allocation5 + $0x198] sm:$0xff]  ;;  %v337_v25 = vld [vmem:[#allocation5 + $0x1a8] sm:$0xff] }
  0x39   :  { %695 = vmatprep.subr.bf16.mxu1 %v841_v0  ;;  %v735_v24 = vpack.c.bf16 %v335_v23, %v334_v21  ;;  %v339_v28 = vld [vmem:[#allocation5 + $0x1b8] sm:$0xff]  ;;  %v340_v30 = vld [vmem:[#allocation5 + $0x1c0] sm:$0xff]  ;;  %v341_v31 = vld [vmem:[#allocation5 + $0x1c8] sm:$0xff] }
  0x3a   :  { %673 = vmatpush3.bf16.msra.mxu0 %v672_v27  ;;  %v338_v27 = vld [vmem:[#allocation5 + $0x1b0] sm:$0xff]  ;;  %v744_v32 = vpack.c.bf16 %v341_v31, %v340_v30  ;;  %v343_v34 = vld [vmem:[#allocation5 + $0x1d8] sm:$0xff] }
  0x3b   :  { %674 = vmatprep.subr.bf16.mxu0 %v841_v0  ;;  %v741_v29 = vpack.c.bf16 %v339_v28, %v338_v27  ;;  %v346_v45 = vld [vmem:[#allocation5 + $0x1f0] sm:$0xff]  ;;  %v347_v46 = vld [vmem:[#allocation5 + $0x1f8] sm:$0xff] }
  0x3c   :  { %697 = vmatpush3.bf16.msra.mxu1 %v696_v36  ;;  %v446_v36 = vld [vmem:[%s962_s2 + $0x1] ss:$0 sm:$0xff]  ;;  %v448_v48 = vld [vmem:[%s962_s2 + $0x2] ss:$0 sm:$0xff] }
  0x3d   :  { %698 = vmatprep.subr.bf16.mxu1 %v841_v0 }
  0x3e   :  { %676 = vmatpush3.bf16.msra.mxu0 %v675_v33  ;;  %v342_v33 = vld [vmem:[#allocation5 + $0x1d0] sm:$0xff] }
  0x3f   :  { %677 = vmatprep.subr.bf16.mxu0 %v841_v0  ;;  %v747_v35 = vpack.c.bf16 %v343_v34, %v342_v33 }
  0x40   :  { %700 = vmatpush3.bf16.msra.mxu1 %v699_v42  ;;  %v344_v42 = vld [vmem:[#allocation5 + $0x1e0] sm:$0xff] }
  0x41   :  { %701 = vmatprep.subr.bf16.mxu1 %v841_v0 }
  0x42   :  { %679 = vmatpush3.bf16.msra.mxu0 %v678_v39 }
  0x43   :  { %680 = vmatprep.subr.bf16.mxu0 %v841_v0 }
  0x44   :  { %703 = vmatpush3.bf16.msra.mxu1 %v702_v47  ;;  %v753_v47 = vpack.c.bf16 %v347_v46, %v346_v45 }
  0x45   :  { %704 = vmatprep.subr.bf16.mxu1 %v841_v0 }
  0x46   :  { %682 = vmatpush3.bf16.msra.mxu0 %v681_v43  ;;  %v345_v43 = vld [vmem:[#allocation5 + $0x1e8] sm:$0xff] }
  0x47   :  { %707 = vmatprep.subr.bf16.mxu0 %v841_v0 }
  0x48   :  { %706 = vmatpush3.bf16.msra.mxu1 %v705_v50 }
  0x49   :  { %552 = vmatmul.mubr.f32.vlgmr.msra.gmra.mrb[0].mxu0 %v41_v44  ;;  %731 = vmatprep.subr.bf16.mxu1 %v841_v0  ;;  %v750_v44 = vpack.c.bf16 %v345_v43, %v344_v42 }
  0x4a   :  { %621 = vmatprep.mubr.msk.f32.mxu0 %vm842_vm0, %v843_v1  ;;  %709 = vmatpush3.bf16.msra.mxu0 %v708_v54  ;;  %v450_v54 = vld [vmem:[%s962_s2 + $0x3] ss:$0 sm:$0xff] }
  0x4b   :  { %710 = vmatprep.subr.bf16.mxu0 %v841_v0 }
  0x4e   :  { %712 = vmatpush3.bf16.msra.mxu0 %v711_v56 }
  0x4f   :  { %713 = vmatprep.subr.bf16.mxu0 %v841_v0 }
  0x52   :  { %715 = vmatpush3.bf16.msra.mxu0 %v714_v59 }
  0x53   :  { %716 = vmatprep.subr.bf16.mxu0 %v841_v0 }
  0x56   :  { %718 = vmatpush3.bf16.msra.mxu0 %v717_v62 }
  0x57   :  { %719 = vmatprep.subr.bf16.mxu0 %v841_v0 }
  0x5a   :  { %721 = vmatpush3.bf16.msra.mxu0 %v720_v3 }
  0x5b   :  { %722 = vmatprep.subr.bf16.mxu0 %v841_v0 }
  0x5e   :  { %724 = vmatpush3.bf16.msra.mxu0 %v723_v6 }
  0x5f   :  { %725 = vmatprep.subr.bf16.mxu0 %v841_v0 }
  0x62   :  { %727 = vmatpush3.bf16.msra.mxu0 %v726_v15 }
  0x63   :  { %728 = vmatprep.subr.bf16.mxu0 %v841_v0 }
  0x66   :  { %730 = vmatpush3.bf16.msra.mxu0 %v729_v18 }
 0x11c   :  { %v131_v8 = vpop.f32.mrb[0].mxu0 }
 0x11d   :  { %v132_v9 = vadd.f32 %v444_v7, %v131_v8  ;;  %v553_v10 = vpop.f32.mrb[1].mxu0 }
 0x11f   :  { %v135_v11 = vmul.f32 0.01, %v132_v9 }
 0x121   :  { %v136_v12 = vmax.f32 %v132_v9, %v135_v11 }
 0x123   :  { %587 = vmatmul.mubr.f32.vlgmr.msra.gmra.mrb[0].mxu1 %v136_v12 }
 0x124   :  { %656 = vmatprep.mubr.msk.f32.mxu1 %vm842_vm0, %v843_v1  ;;  %733 = vmatpush3.bf16.msra.mxu1 %v732_v22  ;;  %v336_v1 = vld [vmem:[#allocation5 + $0x1a0] sm:$0xff] }
 0x125   :  { %734 = vmatprep.subr.bf16.mxu1 %v841_v0  ;;  %v738_v26 = vpack.c.bf16 %v337_v25, %v336_v1 }
 0x128   :  { %736 = vmatpush3.bf16.msra.mxu1 %v735_v24 }
 0x129   :  { %737 = vmatprep.subr.bf16.mxu1 %v841_v0 }
 0x12c   :  { %739 = vmatpush3.bf16.msra.mxu1 %v738_v26 }
 0x12d   :  { %740 = vmatprep.subr.bf16.mxu1 %v841_v0 }
 0x130   :  { %742 = vmatpush3.bf16.msra.mxu1 %v741_v29 }
 0x131   :  { %743 = vmatprep.subr.bf16.mxu1 %v841_v0 }
 0x134   :  { %745 = vmatpush3.bf16.msra.mxu1 %v744_v32 }
 0x135   :  { %746 = vmatprep.subr.bf16.mxu1 %v841_v0 }
 0x138   :  { %748 = vmatpush3.bf16.msra.mxu1 %v747_v35 }
 0x139   :  { %749 = vmatprep.subr.bf16.mxu1 %v841_v0 }
 0x13c   :  { %751 = vmatpush3.bf16.msra.mxu1 %v750_v44 }
 0x13d   :  { %752 = vmatprep.subr.bf16.mxu1 %v841_v0 }
 0x140   :  { %754 = vmatpush3.bf16.msra.mxu1 %v753_v47 }
 0x1f6   :  { %v228_v37 = vpop.f32.mrb[0].mxu1 }
 0x1f7   :  { %v229_v38 = vadd.f32 %v446_v36, %v228_v37  ;;  %v588_v39 = vpop.f32.mrb[1].mxu1 }
 0x1f9   :  { %v232_v40 = vmul.f32 0.01, %v229_v38 }
 0x1fb   :  { %v233_v41 = vmax.f32 %v229_v38, %v232_v40 }
 0x1fd   :  { %622 = vmatmul.mubr.f32.vlgmr.msra.gmra.mrb[2].mxu0 %v233_v41 }
 0x2d0   :  { %v325_v49 = vpop.f32.mrb[2].mxu0 }
 0x2d1   :  { %v326_v50 = vadd.f32 %v448_v48, %v325_v49  ;;  %v623_v51 = vpop.f32.mrb[3].mxu0 }
 0x2d3   :  { %v329_v52 = vmul.f32 0.01, %v326_v50 }
 0x2d5   :  { %v330_v53 = vmax.f32 %v326_v50, %v329_v52 }
 0x2d7   :  { %657 = vmatmul.mubr.f32.vlgmr.msra.gmra.mrb[2].mxu1 %v330_v53 }
 0x3aa   :  { %v422_v55 = vpop.f32.mrb[2].mxu1 }
 0x3ab   :  { %v423_v0 = vadd.f32 %v450_v54, %v422_v55  ;;  %v658_v56 = vpop.f32.mrb[3].mxu1 }
 0x3ad   :  { %763 = vtanh.f32 %v423_v0 }
 0x3b7   :  { %v764_v57 = vpop.eup %763 }
 0x3b8   :  { %427 = vst [vmem:[#allocation7] sm:$0xff] %v764_v57 }
 0x3b9   :  { %820 = shalt.err (!%p817_p6)
}
 0x3ba   :  { %s821_s2 = scalar_lea.hbm %s963_s3, 128 }
 0x3bb   :  { %p822_p7 = scmp.ne.s32.totalorder %s963_s3, %s821_s2  ;;  %p825_p8 = scmp.lt.u32.totalorder %s821_s2, %s963_s3 }
 0x3bd   :  { %p827_p9 = pnand %p825_p8, %p822_p7 }
 0x3bf   :  { %830 = shalt.err (!%p827_p9)
}
 0x3c0   :  { %437 = dma.vmem_to_hbm [thread:$0]  %s435_s18, 128, %s963_s3, [#allocation4]  }
 0x3c1   :  { %835 = dma.done.wait [#allocation4], 128  }
 0x3c2   :  { %836 = vsyncadd [#allocation4], 4294967168 }
 0x3c3   :  { %441 = vsyncpa [#allocation3], 1 }
 0x3c4   :  { %442 = vsyncpa [#allocation6], 1 }
 0x3c5   :  { %443 = vsyncpa [#allocation4], 1 }

</bundles_post_ra>
